<compile_context>
chip_gen: v5e
topology: v5e:2x2
jax: 0.10.0
libtpu: 0.0.40
codegen_flags: <defaults>
</compile_context>

<pallas_src>
import jax
import jax.numpy as jnp
from jax.experimental import pallas as pl
from jax.experimental.pallas import tpu as pltpu

IN_FEATURES = 60
OUT_FEATURES = 10


def _linear_kernel(x_ref, w_ref, b_ref, o_ref):
    # x_ref: (TB, 60), w_ref: (60, 10), b_ref: (1, 10), o_ref: (TB, 10)
    acc = jnp.dot(x_ref[...], w_ref[...], preferred_element_type=jnp.float32)
    o_ref[...] = (acc + b_ref[...]).astype(o_ref.dtype)


def _round_up(a, m):
    return (a + m - 1) // m * m


def synth_net_forward(x, weight, bias, *, tile_b=2048):
    """Forward pass of synth_Net.

    x: any shape whose total size is divisible by 60 (like PyTorch view(-1, 60)).
    weight: (10, 60) as in nn.Linear.  bias: (10,).
    Returns (B, 10) where B = x.size // 60.
    """
    x2d = x.reshape(-1, IN_FEATURES).astype(jnp.float32)
    B = x2d.shape[0]
    w_t = weight.astype(jnp.float32).T                         # (60, 10)
    b2d = bias.astype(jnp.float32).reshape(1, OUT_FEATURES)    # (1, 10)

    # Batch tile: multiple of 8 (sublane); ~2k rows for large batches.
    if B <= tile_b:
        tb = _round_up(max(B, 8), 8)
        b_pad = tb
    else:
        tb = tile_b
        b_pad = _round_up(B, tb)

    if b_pad != B:
        x2d = jnp.pad(x2d, ((0, b_pad - B), (0, 0)))

    grid = (b_pad // tb,)

    cost = pl.CostEstimate(
        flops=2 * b_pad * IN_FEATURES * OUT_FEATURES,
        transcendentals=0,
        bytes_accessed=(b_pad * IN_FEATURES * 4          # x read
                        + b_pad * OUT_FEATURES * 4       # out write
                        + IN_FEATURES * OUT_FEATURES * 4 # W read
                        + OUT_FEATURES * 4),             # bias read
    )

    out = pl.pallas_call(
        _linear_kernel,
        out_shape=jax.ShapeDtypeStruct((b_pad, OUT_FEATURES), jnp.float32),
        grid=grid,
        in_specs=[
            # x: tiled along batch (pipelined).
            pl.BlockSpec((tb, IN_FEATURES), lambda i: (i, 0)),
            # W / bias: constant index_map -> VMEM-resident across grid steps.
            pl.BlockSpec((IN_FEATURES, OUT_FEATURES), lambda i: (0, 0)),
            pl.BlockSpec((1, OUT_FEATURES), lambda i: (0, 0)),
        ],
        out_specs=pl.BlockSpec((tb, OUT_FEATURES), lambda i: (i, 0)),
        compiler_params=pltpu.CompilerParams(
            dimension_semantics=("parallel",)),
        cost_estimate=cost,
    )(x2d, w_t, b2d)

    return out[:B]


def init_params(key):
    """Deterministic init matching nn.Linear(60, 10) shapes."""
    kw, kb = jax.random.split(key)
    bound = 1.0 / jnp.sqrt(float(IN_FEATURES))
    weight = jax.random.uniform(kw, (OUT_FEATURES, IN_FEATURES), jnp.float32,
                                -bound, bound)
    bias = jax.random.uniform(kb, (OUT_FEATURES,), jnp.float32, -bound, bound)
    return weight, bias


if __name__ == "__main__":
    key = jax.random.PRNGKey(0)
    k_x, k_p, k_big = jax.random.split(key, 3)
    weight, bias = init_params(k_p)

    # Small input consistent with view(-1, 60): (2, 2, 30) -> (2, 60)
    x = jax.random.normal(k_x, (2, 2, 30), jnp.float32)
    out = synth_net_forward(x, weight, bias)
    out = jax.block_until_ready(out)
    ref = x.reshape(-1, IN_FEATURES) @ weight.T + bias
    assert out.shape == (2, OUT_FEATURES)
    assert jnp.allclose(out, ref, atol=1e-5, rtol=1e-5)

    # Medium batch to exercise the tiled / padded (grid > 1, remainder) path.
    x_big = jax.random.normal(k_big, (4100, IN_FEATURES), jnp.float32)
    out_big = synth_net_forward(x_big, weight, bias, tile_b=2048)
    out_big = jax.block_until_ready(out_big)
    ref_big = x_big @ weight.T + bias
    assert out_big.shape == (4100, OUT_FEATURES)
    assert jnp.allclose(out_big, ref_big, atol=1e-4, rtol=1e-4)

    print("KERNEL_OK")
</pallas_src>

<mosaic_0001>
module attributes {stable_mosaic.version = 11 : i64} {
  func.func @_linear_kernel(%arg0: i32, %arg1: memref<8x60xf32, #tpu.memory_space<vmem>>, %arg2: memref<60x10xf32, #tpu.memory_space<vmem>>, %arg3: memref<1x10xf32, #tpu.memory_space<vmem>>, %arg4: memref<8x10xf32, #tpu.memory_space<vmem>>) attributes {dimension_semantics = [#tpu.dimension_semantics<parallel>], iteration_bounds = array<i64: 1>, scalar_prefetch = 0 : i64, scratch_operands = 0 : i64, tpu.core_type = #tpu.core_type<tc>, window_params = [{transform_indices = @transform_0, window_bounds = array<i64: 8, 60>}, {pipeline_mode = #tpu.pipeline_mode<synchronous>, transform_indices = @transform_1, window_bounds = array<i64: 60, 10>}, {pipeline_mode = #tpu.pipeline_mode<synchronous>, transform_indices = @transform_2, window_bounds = array<i64: 1, 10>}, {transform_indices = @transform_3, window_bounds = array<i64: 8, 10>}]} {
    %c0 = arith.constant 0 : index
    %c0_0 = arith.constant 0 : index
    %0 = vector.load %arg1[%c0, %c0_0] : memref<8x60xf32, #tpu.memory_space<vmem>>, vector<8x60xf32>
    %c0_1 = arith.constant 0 : index
    %c0_2 = arith.constant 0 : index
    %1 = vector.load %arg2[%c0_1, %c0_2] : memref<60x10xf32, #tpu.memory_space<vmem>>, vector<60x10xf32>
    %cst = arith.constant dense<0.000000e+00> : vector<8x10xf32>
    %2 = tpu.matmul %0, %1, %cst {dimension_numbers = #tpu.dot_dimension_numbers<[1], [0], [0], [1], [0, 0, 1, 1], [], []>} : vector<8x60xf32>, vector<60x10xf32>, vector<8x10xf32> -> vector<8x10xf32>
    %c0_3 = arith.constant 0 : index
    %c0_4 = arith.constant 0 : index
    %3 = vector.load %arg3[%c0_3, %c0_4] : memref<1x10xf32, #tpu.memory_space<vmem>>, vector<1x10xf32>
    %4 = vector.broadcast %3 : vector<1x10xf32> to vector<8x10xf32>
    %5 = arith.addf %2, %4 : vector<8x10xf32>
    %c0_5 = arith.constant 0 : index
    %c0_6 = arith.constant 0 : index
    %6 = vector.load %arg4[%c0_5, %c0_6] : memref<8x10xf32, #tpu.memory_space<vmem>>, vector<8x10xf32>
    tpu.vector_store %arg4[%c0_5, %c0_6], %5 {strides = array<i32>} : memref<8x10xf32, #tpu.memory_space<vmem>>, vector<8x10xf32>,
    return
  }
  func.func @transform_0(%arg0: i32) -> (i32, i32) {
    %c0_i32 = arith.constant 0 : i32
    %c0_i32_0 = arith.constant 0 : i32
    return %arg0, %c0_i32 : i32, i32
  }
  func.func @transform_1(%arg0: i32) -> (i32, i32) {
    %c0_i32 = arith.constant 0 : i32
    %c0_i32_0 = arith.constant 0 : i32
    %c0_i32_1 = arith.constant 0 : i32
    return %c0_i32, %c0_i32_0 : i32, i32
  }
  func.func @transform_2(%arg0: i32) -> (i32, i32) {
    %c0_i32 = arith.constant 0 : i32
    %c0_i32_0 = arith.constant 0 : i32
    %c0_i32_1 = arith.constant 0 : i32
    return %c0_i32, %c0_i32_0 : i32, i32
  }
  func.func @transform_3(%arg0: i32) -> (i32, i32) {
    %c0_i32 = arith.constant 0 : i32
    %c0_i32_0 = arith.constant 0 : i32
    return %arg0, %c0_i32 : i32, i32
  }
}

</mosaic_0001>

<bundles_post_ra>
// kernel: tpu_custom_call.1
= control target key start
LH: loop header
LB: loop body
LE: loop exit
PB: predicated region body
PF: predicated region fallthrough
CT: control target
= control target key end

     0   :  { %vm32_vm0 = vcmask 1043456   ;;  %s158_s0 = inlined_call_operand.vmem [shape: f32[8,60], index: 0, kind: input, shape index: {}]   ;;  %s159_s1 = inlined_call_operand.vmem [shape: f32[60,10], index: 1, kind: input, shape index: {}]   ;;  %s160_s2 = inlined_call_operand.vmem [shape: f32[1,10], index: 2, kind: input, shape index: {}]   ;;  %s161_s3 = inlined_call_operand.hbm [shape: f32[8,10], index: 3, kind: output, shape index: {}]  }
   0x1   :  { %v23_v0 = vld [vmem:[%s159_s1 + $0x38] sm:$0xf]  ;;  %v22_v1 = vld [vmem:[%s159_s1 + $0x30] sm:$0xff]  ;;  %v21_v2 = vld [vmem:[%s159_s1 + $0x28] sm:$0xff] }
   0x2   :  { %74 = vmatpush.msk.msra.mxu0 %vm32_vm0, %v23_v0 }
   0x4   :  { %45 = vmatpush.msra.mxu0 %v22_v1 }
   0x5   :  { %8 = vsyncpa [#allocation3], 0  ;;  %v20_v3 = vld [vmem:[%s159_s1 + $0x20] sm:$0xff]  ;;  %v19_v4 = vld [vmem:[%s159_s1 + $0x18] sm:$0xff]  ;;  %vm28_vm1 = vcmask 490496   ;;  %s104_s5 = smov [#allocation2]  }
   0x6   :  { %46 = vmatpush.msra.mxu0 %v21_v2  ;;  %v18_v5 = vld [vmem:[%s159_s1 + $0x10] sm:$0xff]  ;;  %v17_v6 = vld [vmem:[%s159_s1 + $0x8] sm:$0xff]  ;;  %v16_v7 = vld [vmem:[%s159_s1] sm:$0xff]  ;;  %s63_s6 = sshll.u32 %s104_s5, 4  ;;  %s65_s9 = sshll.u32 %s161_s3, 4  ;;  %vm56_vm2 = vcmask 80896   ;;  %s64_s6 = int_to_ptr.vmem [resolvable:$true] %s63_s6  ;;  %s66_s9 = int_to_ptr.hbm [resolvable:$true] %s65_s9 }
   0x7   :  { %v15_v8 = vld [vmem:[%s158_s0] sm:$0xff] }
   0x8   :  { %47 = vmatpush.msra.mxu0 %v20_v3  ;;  %v77_v9 = vld [vmem:[%s160_s2] ss:$0 sm:$0xff] }
   0xa   :  { %48 = vmatpush.msra.mxu0 %v19_v4 }
   0xc   :  { %49 = vmatpush.msra.mxu0 %v18_v5 }
   0xe   :  { %50 = vmatpush.msra.mxu0 %v17_v6 }
  0x10   :  { %51 = vmatpush.msra.mxu0 %v16_v7 }
  0x11   :  { %75 = vmatmul.msk.f32.vlgmr.msra.gmra.mxu0 %vm28_vm1, %v15_v8 }
  0x8e   :  { %v53_v10 = vpop.f32.mrf.mxu0 }
  0x8f   :  { %v54_v11 = vadd.f32 %v77_v9, %v53_v10 }
  0x91   :  { %57 = vst.msk [vmem:[#allocation2] sm:$0xff] %vm56_vm2, %v54_v11 }
  0x92   :  { %68 = dma.vmem_to_hbm [thread:$0]  %s64_s6, 128, %s66_s9, [#allocation3]  }
  0x93   :  { %102 = dma.done.wait [#allocation3], 128  }
  0x94   :  { %103 = vsyncadd [#allocation3], 4294967168 }
  0x95   :  { %73 = vsyncpa [#allocation3], 1 }

</bundles_post_ra>
